<compile_context>
chip_gen: v7x
topology: tpu7x:2x2x1
jax: 0.10.0
libtpu: 0.0.40
codegen_flags: <defaults>
</compile_context>

<pallas_src>
import jax
import jax.numpy as jnp
from jax.experimental import pallas as pl
from jax.experimental.pallas import tpu as pltpu


def _round_up(x, m):
    return ((x + m - 1) // m) * m


def _make_ios_detect_kernel(cin, use_mxu):
    """Build the fused head kernel for a fixed (static) Cin."""

    def kernel(x_ref, w_ref, b_ref, out_ref):
        # x_ref:   (Cin,  TILE_N)  channel-major activations (lane-dense over N)
        # w_ref:   (Cout, Cin)     normalize-folded 1x1-conv head weight
        # b_ref:   (Cout, 1)       normalize-folded head bias (column vector)
        # out_ref: (Cout, TILE_N)  combined [xywh*norm ; cls] predictions
        x = x_ref[...].astype(jnp.float32)
        w = w_ref[...].astype(jnp.float32)
        b = b_ref[...].astype(jnp.float32)

        if use_mxu:
            # Realistic head (Cin >= 64): use the MXU, accumulate in f32.
            acc = jnp.dot(w, x, preferred_element_type=jnp.float32) + b
        else:
            # Tiny contraction: unrolled VPU outer-product FMAs — avoids padding
            # a K=4 matmul up to the full MXU tile and the MRF/MRB drain latency.
            acc = jnp.broadcast_to(b, out_ref.shape)
            for c in range(cin):
                acc = acc + w[:, c : c + 1] * x[c : c + 1, :]

        out_ref[...] = acc.astype(out_ref.dtype)

    return kernel


def ios_detect_forward(x, w_head, b_head, nc, *, tile_n=1024,
                       compute_dtype=jnp.float32):
    """JAX wrapper reproducing IOSDetectModel.forward semantics.

    Returns (cls, xywh * normalize) for batch element 0, shapes (N, nc), (N, 4).
    `compute_dtype=jnp.bfloat16` halves operand HBM traffic (accumulation stays
    f32); keep f32 for bit-tight comparisons against an f32 reference.
    """
    B, Cin, H, W = x.shape
    N = H * W
    Cout = 4 + nc
    assert w_head.shape == (Cout, Cin) and b_head.shape == (Cout,)

    # self.normalize from IOSDetectModel.__init__
    if W == H:
        norm4 = jnp.full((4,), 1.0 / W, dtype=jnp.float32)       # scalar case
    else:
        norm4 = jnp.array([1.0 / W, 1.0 / H, 1.0 / W, 1.0 / H], dtype=jnp.float32)
    scale = jnp.concatenate([norm4, jnp.ones((nc,), jnp.float32)])  # (Cout,)

    # Fold normalize into the linear head (exact): xywh rows pre-scaled.
    w_folded = (w_head.astype(jnp.float32) * scale[:, None]).astype(compute_dtype)
    b_folded = (b_head.astype(jnp.float32) * scale).reshape(Cout, 1)  # f32 bias

    # model(x)[0] -> only batch element 0 feeds the head.
    # TODO(synk): full YOLO backbone replaced by a deterministic 1x1-conv head.
    # Keep natural channel-major (Cin, N) layout (contiguous from NCHW):
    # no host transpose, and N lands in the lane dimension.
    x_flat = x[0].reshape(Cin, N).astype(compute_dtype)

    # Tile over N (lane axis). Tiles sized well inside every chip's VMEM
    # (v7x 64 MiB / v6e,v5e 128 MiB): per-step buffers here are only
    # ~2*(Cin+Cout)*tile_n*4 bytes, far below the scoped default.
    tile_n = _round_up(max(128, min(int(tile_n), _round_up(N, 128))), 128)
    n_pad = pl.cdiv(N, tile_n) * tile_n
    if n_pad != N:
        x_flat = jnp.pad(x_flat, ((0, 0), (0, n_pad - N)))
    grid = (n_pad // tile_n,)

    use_mxu = Cin >= 64  # tiny contractions stay on the VPU
    kernel = _make_ios_detect_kernel(Cin, use_mxu)

    out = pl.pallas_call(
        kernel,
        out_shape=jax.ShapeDtypeStruct((Cout, n_pad), jnp.float32),
        grid=grid,
        in_specs=[
            pl.BlockSpec((Cin, tile_n), lambda i: (0, i)),   # activations tile
            pl.BlockSpec((Cout, Cin), lambda i: (0, 0)),     # folded weight (resident)
            pl.BlockSpec((Cout, 1), lambda i: (0, 0)),       # folded bias (resident)
        ],
        out_specs=pl.BlockSpec((Cout, tile_n), lambda i: (0, i)),
        compiler_params=pltpu.CompilerParams(
            dimension_semantics=("parallel",),   # shard row axis across v7x's 2 TCs
        ),
    )(x_flat, w_folded, b_folded)

    # Cheap XLA-side split/transpose of the tiny (Cout, N) result back to the
    # module's return layout; xywh rows are already scaled by `normalize`.
    preds = out[:, :N]
    xywh = preds[:4, :].T      # (N, 4)
    cls = preds[4:, :].T       # (N, nc)
    return cls, xywh


if __name__ == "__main__":
    key = jax.random.PRNGKey(0)
    B, Cin, H, W = 2, 4, 16, 16      # small NCHW input
    nc = 4                            # len(model.names)
    Cout = 4 + nc

    kx, kw, kb = jax.random.split(key, 3)
    x = jax.random.normal(kx, (B, Cin, H, W), dtype=jnp.float32)
    w_head = 0.1 * jax.random.normal(kw, (Cout, Cin), dtype=jnp.float32)
    b_head = 0.1 * jax.random.normal(kb, (Cout,), dtype=jnp.float32)

    # tile_n=128 -> 2 grid steps even at this small spatial size (exercises the
    # pipelined grid path); real inputs would use the 1024-row default.
    cls, xywh = ios_detect_forward(x, w_head, b_head, nc, tile_n=128)
    cls, xywh = jax.block_until_ready((cls, xywh))

    # Pure-JAX reference of the same forward (head -> [0] -> transpose -> split -> scale).
    preds_ref = (w_head @ x[0].reshape(Cin, H * W) + b_head[:, None]).T  # (N, 4+nc)
    ref_xywh = preds_ref[:, :4] * (1.0 / W)    # W == H -> scalar normalize
    ref_cls = preds_ref[:, 4:]
    assert cls.shape == (H * W, nc) and xywh.shape == (H * W, 4)
    assert jnp.allclose(cls, ref_cls, atol=1e-5, rtol=1e-5)
    assert jnp.allclose(xywh, ref_xywh, atol=1e-5, rtol=1e-5)

    print("KERNEL_OK")
</pallas_src>

<mosaic_0001>
module attributes {stable_mosaic.version = 11 : i64} {
  func.func @kernel(%arg0: i32, %arg1: memref<4x128xf32, #tpu.memory_space<vmem>>, %arg2: memref<8x4xf32, #tpu.memory_space<vmem>>, %arg3: memref<8x1xf32, #tpu.memory_space<vmem>>, %arg4: memref<8x128xf32, #tpu.memory_space<vmem>>) attributes {dimension_semantics = [#tpu.dimension_semantics<parallel>], iteration_bounds = array<i64: 2>, scalar_prefetch = 0 : i64, scratch_operands = 0 : i64, tpu.core_type = #tpu.core_type<tc>, window_params = [{transform_indices = @transform_0, window_bounds = array<i64: 4, 128>}, {pipeline_mode = #tpu.pipeline_mode<synchronous>, transform_indices = @transform_1, window_bounds = array<i64: 8, 4>}, {pipeline_mode = #tpu.pipeline_mode<synchronous>, transform_indices = @transform_2, window_bounds = array<i64: 8, 1>}, {transform_indices = @transform_3, window_bounds = array<i64: 8, 128>}]} {
    %c0 = arith.constant 0 : index
    %c0_0 = arith.constant 0 : index
    %0 = vector.load %arg1[%c0, %c0_0] : memref<4x128xf32, #tpu.memory_space<vmem>>, vector<4x128xf32>
    %c0_1 = arith.constant 0 : index
    %c0_2 = arith.constant 0 : index
    %1 = vector.load %arg2[%c0_1, %c0_2] : memref<8x4xf32, #tpu.memory_space<vmem>>, vector<8x4xf32>
    %c0_3 = arith.constant 0 : index
    %c0_4 = arith.constant 0 : index
    %2 = vector.load %arg3[%c0_3, %c0_4] : memref<8x1xf32, #tpu.memory_space<vmem>>, vector<8x1xf32>
    %3 = vector.shape_cast %2 : vector<8x1xf32> to vector<8x1xf32>
    %4 = vector.broadcast %3 : vector<8x1xf32> to vector<8x128xf32>
    %5 = vector.extract_strided_slice %1 {offsets = [0, 0], sizes = [8, 1], strides = [1, 1]} : vector<8x4xf32> to vector<8x1xf32>
    %6 = vector.extract_strided_slice %0 {offsets = [0, 0], sizes = [1, 128], strides = [1, 1]} : vector<4x128xf32> to vector<1x128xf32>
    %7 = vector.broadcast %5 : vector<8x1xf32> to vector<8x128xf32>
    %8 = vector.broadcast %6 : vector<1x128xf32> to vector<8x128xf32>
    %9 = arith.mulf %7, %8 : vector<8x128xf32>
    %10 = arith.addf %4, %9 : vector<8x128xf32>
    %11 = vector.extract_strided_slice %1 {offsets = [0, 1], sizes = [8, 1], strides = [1, 1]} : vector<8x4xf32> to vector<8x1xf32>
    %12 = vector.extract_strided_slice %0 {offsets = [1, 0], sizes = [1, 128], strides = [1, 1]} : vector<4x128xf32> to vector<1x128xf32>
    %13 = vector.broadcast %11 : vector<8x1xf32> to vector<8x128xf32>
    %14 = vector.broadcast %12 : vector<1x128xf32> to vector<8x128xf32>
    %15 = arith.mulf %13, %14 : vector<8x128xf32>
    %16 = arith.addf %10, %15 : vector<8x128xf32>
    %17 = vector.extract_strided_slice %1 {offsets = [0, 2], sizes = [8, 1], strides = [1, 1]} : vector<8x4xf32> to vector<8x1xf32>
    %18 = vector.extract_strided_slice %0 {offsets = [2, 0], sizes = [1, 128], strides = [1, 1]} : vector<4x128xf32> to vector<1x128xf32>
    %19 = vector.broadcast %17 : vector<8x1xf32> to vector<8x128xf32>
    %20 = vector.broadcast %18 : vector<1x128xf32> to vector<8x128xf32>
    %21 = arith.mulf %19, %20 : vector<8x128xf32>
    %22 = arith.addf %16, %21 : vector<8x128xf32>
    %23 = vector.extract_strided_slice %1 {offsets = [0, 3], sizes = [8, 1], strides = [1, 1]} : vector<8x4xf32> to vector<8x1xf32>
    %24 = vector.extract_strided_slice %0 {offsets = [3, 0], sizes = [1, 128], strides = [1, 1]} : vector<4x128xf32> to vector<1x128xf32>
    %25 = vector.broadcast %23 : vector<8x1xf32> to vector<8x128xf32>
    %26 = vector.broadcast %24 : vector<1x128xf32> to vector<8x128xf32>
    %27 = arith.mulf %25, %26 : vector<8x128xf32>
    %28 = arith.addf %22, %27 : vector<8x128xf32>
    %c0_5 = arith.constant 0 : index
    %c0_6 = arith.constant 0 : index
    %29 = vector.load %arg4[%c0_5, %c0_6] : memref<8x128xf32, #tpu.memory_space<vmem>>, vector<8x128xf32>
    tpu.vector_store %arg4[%c0_5, %c0_6], %28 {strides = array<i32>} : memref<8x128xf32, #tpu.memory_space<vmem>>, vector<8x128xf32>,
    return
  }
  func.func @transform_0(%arg0: i32) -> (i32, i32) {
    %c0_i32 = arith.constant 0 : i32
    %c0_i32_0 = arith.constant 0 : i32
    return %c0_i32, %arg0 : i32, i32
  }
  func.func @transform_1(%arg0: i32) -> (i32, i32) {
    %c0_i32 = arith.constant 0 : i32
    %c0_i32_0 = arith.constant 0 : i32
    %c0_i32_1 = arith.constant 0 : i32
    return %c0_i32, %c0_i32_0 : i32, i32
  }
  func.func @transform_2(%arg0: i32) -> (i32, i32) {
    %c0_i32 = arith.constant 0 : i32
    %c0_i32_0 = arith.constant 0 : i32
    %c0_i32_1 = arith.constant 0 : i32
    return %c0_i32, %c0_i32_0 : i32, i32
  }
  func.func @transform_3(%arg0: i32) -> (i32, i32) {
    %c0_i32 = arith.constant 0 : i32
    %c0_i32_0 = arith.constant 0 : i32
    return %c0_i32, %arg0 : i32, i32
  }
}

</mosaic_0001>

<bundles_post_ra>
// kernel: tpu_custom_call.1
= control target key start
LH: loop header
LB: loop body
LE: loop exit
PB: predicated region body
PF: predicated region fallthrough
CT: control target
= control target key end

     0   :  { %8 = vsyncpa [#allocation3], 0  ;;  %s541_s0 = inlined_call_operand.vmem [shape: f32[4,256], index: 0, kind: input, shape index: {}]   ;;  %s542_s1 = inlined_call_operand.vmem [shape: f32[8,4], index: 1, kind: input, shape index: {}]   ;;  %s543_s2 = inlined_call_operand.vmem [shape: f32[8,1], index: 2, kind: input, shape index: {}]   ;;  %s544_s3 = inlined_call_operand.hbm [shape: f32[8,256], index: 3, kind: output, shape index: {}]  }
   0x1   :  { %10 = vsyncpa [#allocation3 + $0x1], 0  ;;  %s435_s12 = smov 0   ;;  %s437_s13 = smov 0  }
   0x2   :  { %s439_s14 = smov 0   ;;  %s441_s15 = smov 0  }
   0x3 LB: > { %s456_s16 = sadd.s32 4294967295, %s408_s15   ;;  %s289_s17 = sadd.s32 4294967294, %s408_s15   ;;  %s408_s15 = sphi %s441_s15, %s550_s15   ;;  %s404_s14 = sphi %s439_s14, %s549_s14   ;;  %s400_s13 = sphi %s437_s13, %s548_s13   ;;  %s396_s12 = sphi %s435_s12, %s547_s12  }
   0x4   : > { %s460_s18 = sadd.s32 1, %s408_s15   ;;  %s91_s19 = sadd.s32 1, %s404_s14 }
   0x5   : > { %s88_s20 = ssub.s32 %s408_s15, %s460_s18  ;;  %p101_p0 = scmp.ne.s32.totalorder %s404_s14, %s400_s13 }
   0x6   : > { %p89_p1 = scmp.eq.s32.totalorder %s88_s20, 0  ;;  %p102_p2 = scmp.eq.s32.totalorder %s456_s16, 1 }
   0x7   : > { %p107_p3 = scmp.ne.s32.totalorder %s400_s13, %s396_s12  ;;  %p108_p4 = scmp.eq.s32.totalorder %s289_s17, 1 }
   0x8   : > { %s471_s21 = scalar_select %p89_p1, %s404_s14, %s91_s19  }
   0x9   : > { %p473_p5 = por %p102_p2, %p101_p0  ;;  %p477_p6 = por %p108_p4, %p107_p3 }
   0xa   : > { %p292_p7 = scmp.ge.s32.totalorder %s408_s15, 1  ;;  %p139_p8 = scmp.lt.s32.totalorder %s408_s15, 3 }
   0xc   : > { %p140_p9 = pnand %p292_p7, %p139_p8 }
   0xd   : > { %v167_v0 = vld [vmem:[%s542_s1] sm:$0xff] (!%p140_p9)  ;;  %v410_v1 = vmov (!%p140_p9), 0   ;;  %v411_v2 = vmov (!%p140_p9), 1   ;;  %v412_v4 = vmov (!%p140_p9), 2   ;;  %v413_v5 = vmov (!%p140_p9), 3   ;;  %p162_p10 = scmp.lt.s32.totalorder (!%p140_p9), %s456_s16, 1 }
   0xe   : > { %143 = sbr.rel (%p140_p9) target bundleno = 170 (0xaa), region = 32  ;;  %342 = vset.pattern.permute.xlu0 (!%p140_p9), %v410_v1  ;;  %343 = vset.pattern.permute.xlu1 (!%p140_p9), %v411_v2  ;;  %v168_v3 = vld [vmem:[%s543_s2] sm:$0xff] (!%p140_p9)  ;;  %v179_v6 = vlaneseq (!%p140_p9)  ;;  %s159_s6 = sand.u32 (!%p140_p9), 1, %s400_s13  }
   0xf   : > { %176 = vperm.xlu0 (!%p140_p9), %342, %v167_v0   ;;  %186 = vperm.xlu1 (!%p140_p9), %343, %v167_v0   ;;  %s293_s7 = sshll.u32 (!%p140_p9), %s159_s6, 3  ;;  %s296_s8 = sshll.u32 (!%p140_p9), %s456_s16, 7 }
  0x10   : > { %v180_v7 = vshrl.u32 (!%p140_p9), %v179_v6, 7  ;;  %s161_s9 = scalar_lea.vmem (!%p140_p9), [#allocation2], %s293_s7  ;;  %s499_s19 = scalar_lea.hbm (!%p140_p9), %s544_s3, %s296_s8 }
  0x11   : > { %s230_s10 = sshll.u32 (!%p140_p9), %s161_s9, 4  ;;  %s217_s20 = scalar_lea.sflag (!%p140_p9), [#allocation3], %s159_s6  ;;  %s501_s10 = int_to_ptr.vmem [resolvable:$true] %s230_s10 }
  0x12   : > { %v181_v8 = vsub.s32 (!%p140_p9), 0, %v180_v7  ;;  %v191_v10 = vsub.s32 (!%p140_p9), 1, %v180_v7  ;;  %v201_v11 = vsub.s32 (!%p140_p9), 2, %v180_v7  ;;  %v211_v17 = vsub.s32 (!%p140_p9), 3, %v180_v7  ;;  %s346_s24 = scalar_lea.vmem (!%p140_p9), %s501_s10, 128 }
  0x13   : > { %171 = vperm.xlu0 (!%p140_p9), %342, %v168_v3   ;;  %344 = vset.pattern.permute.xlu1 (!%p140_p9), %v412_v4  ;;  %p347_p11 = scmp.ne.s32.totalorder (!%p140_p9), %s501_s10, %s346_s24 }
  0x14   : > { %196 = vperm.xlu1 (!%p140_p9), %344, %v167_v0  }
  0x15   : > { %s163_s28 = scalar_select %p162_p10, %s456_s16, 1 }
  0x16   : > { %p348_p12 = pnand %p347_p11, %p473_p5  ;;  %s414_s16 = smov [#allocation2]  }
  0x17   : > { %345 = vset.pattern.permute.xlu0 %v413_v5  ;;  %s294_s29 = sshll.u32 %s163_s28, 2  ;;  %s350_s25 = sshll.u32 %s414_s16, 4  ;;  %s351_s25 = int_to_ptr.vmem [resolvable:$false] %s350_s25 }
  0x18   : > { %206 = vperm.xlu0 %345, %v167_v0   ;;  %s165_s5 = scalar_lea.vmem %s541_s0, %s294_s29  ;;  %p349_p13 = pneg %p348_p12 }
  0x19   : > { %v166_v9 = vld [vmem:[%s165_s5] sm:$0xf]  ;;  %s352_s26 = scalar_lea.vmem %s351_s25, 256  ;;  %p353_p0 = scmp.lt.s32.totalorder %s501_s10, %s351_s25 }
  0x1a   : > { %v182_v12 = vrot.slane %v166_v9, %v181_v8  ;;  %v192_v15 = vrot.slane %v166_v9, %v191_v10  ;;  %v202_v16 = vrot.slane %v166_v9, %v201_v11  ;;  %v212_v24 = vrot.slane %v166_v9, %v211_v17  ;;  %p354_p1 = scmp.lt.s32.totalorder %s352_s26, %s346_s24 }
  0x1c   : > { %p355_p2 = por %p354_p1, %p353_p0 }
  0x1e   : > { %p356_p3 = pnand %p355_p2, %p349_p13 }
  0x8e   : > { %v177_v13 = vpop.permute.xlu0 %176  ;;  %v187_v14 = vpop.permute.xlu1 %186 }
  0x8f   : > { %v183_v18 = vmul.f32 %v182_v12, %v177_v13  ;;  %v193_v20 = vmul.f32 %v192_v15, %v187_v14 }
  0x92   : > { %v172_v19 = vpop.permute.xlu0 %171 }
  0x93   : > { %v184_v21 = vadd.f32 %v183_v18, %v172_v19  ;;  %v197_v22 = vpop.permute.xlu1 %196 }
  0x94   : > { %v203_v23 = vmul.f32 %v202_v16, %v197_v22 }
  0x95   : > { %v194_v25 = vadd.f32 %v193_v20, %v184_v21 }
  0x97   : > { %v204_v26 = vadd.f32 %v203_v23, %v194_v25  ;;  %v207_v27 = vpop.permute.xlu0 %206 }
  0x98   : > { %v213_v28 = vmul.f32 %v212_v24, %v207_v27 }
  0x9a   : > { %v214_v29 = vadd.f32 %v213_v28, %v204_v26 }
  0x9c   : > { %215 = vst [vmem:[%s161_s9] sm:$0xff] %v214_v29 }
  0x9d   : > { %359 = shalt.err (!%p356_p3)
}
  0x9e   : > { %s360_s27 = scalar_lea.hbm %s499_s19, 128  ;;  %s364_s30 = scalar_lea.hbm %s544_s3, 256 }
  0x9f   : > { %p361_p4 = scmp.ne.s32.totalorder %s499_s19, %s360_s27  ;;  %p365_p9 = scmp.lt.u32.totalorder %s499_s19, %s544_s3 }
  0xa0   : > { %p366_p10 = scmp.lt.u32.totalorder %s364_s30, %s360_s27  ;;  %p368_p12 = scmp.lt.u32.totalorder %s360_s27, %s499_s19 }
  0xa1   : > { %p362_p7 = pnand %p361_p4, %p473_p5 }
  0xa2   : > { %p367_p11 = por %p366_p10, %p365_p9 }
  0xa3   : > { %p363_p8 = pneg %p362_p7 }
  0xa4   : > { %p369_p13 = por %p368_p12, %p367_p11 }
  0xa6   : > { %p370_p0 = pnand %p369_p13, %p363_p8 }
  0xa8   : > { %373 = shalt.err (!%p370_p0)
}
  0xa9   : > { %299 = dma.vmem_to_hbm [thread:$0]  (%p473_p5), %s501_s10, 128, %s499_s19, %s217_s20  }
  0xaa PF: > { %p305_p1 = scmp.ge.s32.totalorder %s408_s15, 2  ;;  %s242_s6 = sand.u32 1, %s396_s12  }
  0xab   : > { %s243_s7 = scalar_lea.sflag [#allocation3], %s242_s6 }
  0xac   : > { %p302_p2 = pnand %p305_p1, %p477_p6 }
  0xae   : > { %391 = dma.done.wait (!%p302_p2), %s243_s7, 128  }
  0xaf   : > { %393 = vsyncadd (!%p302_p2), %s243_s7, 4294967168  ;;  %p13_p3 = scmp.ge.s32.totalorder %s460_s18, 4   ;;  %s547_s12 = smov %s400_s13 }
  0xb0   : > { %s548_s13 = smov %s404_s14  ;;  %s549_s14 = smov %s471_s21 }
  0xb1   : > { %s550_s15 = smov %s460_s18  ;;  %15 = sbr.rel (!%p13_p3) target bundleno = 3 (0x3), region = 67 }
  0xb8   :  { %248 = vsyncpa [#allocation3], 1 }
  0xb9   :  { %250 = vsyncpa [#allocation3 + $0x1], 1 }

</bundles_post_ra>
